<compile_context>
chip_gen: v7x
topology: tpu7x:2x2x1
jax: 0.10.0
libtpu: 0.0.40
codegen_flags: <defaults>
</compile_context>

<pallas_src>
import jax
import jax.numpy as jnp
from jax.experimental import pallas as pl
from jax.experimental.pallas import tpu as pltpu


def _share_ppo_fwd_kernel(s_ref, w1_ref, b1_ref, w23_ref, b23_ref,
                          w4_ref, b4_ref, out_ref):
    x = s_ref[...].astype(jnp.float32)

    # enc_s first Linear + ReLU
    h = jnp.dot(x, w1_ref[...], preferred_element_type=jnp.float32) + b1_ref[...]
    h = jnp.maximum(h, 0.0)

    # fused (enc_s second Linear) o (dec_a first Linear) + ReLU
    g = jnp.dot(h, w23_ref[...], preferred_element_type=jnp.float32) + b23_ref[...]
    g = jnp.maximum(g, 0.0)

    # dec_a second Linear + tanh
    a_avg = jnp.dot(g, w4_ref[...], preferred_element_type=jnp.float32) + b4_ref[...]
    out_ref[...] = jnp.tanh(a_avg).astype(out_ref.dtype)


def _round_up(x, m):
    return ((x + m - 1) // m) * m


def share_ppo_forward(s, params, *, block_b=None):
    """Pallas implementation of SharePPO.forward(s) for int state_dim.

    s:      (B, state_dim) float array.
    params: dict with w1 (state_dim, mid), b1 (1, mid), w2 (mid, mid),
            b2 (1, mid), w3 (mid, mid), b3 (1, mid),
            w4 (mid, action_dim), b4 (1, action_dim).
    Returns (B, action_dim) = tanh(dec_a(enc_s(s))).
    """
    w1, b1 = params["w1"], params["b1"]
    w2, b2 = params["w2"], params["b2"]
    w3, b3 = params["w3"], params["b3"]
    w4, b4 = params["w4"], params["b4"]

    B, state_dim = s.shape
    mid = w1.shape[1]
    action_dim = w4.shape[1]

    # Host-side algebraic fusion (no nonlinearity between these two Linears).
    # Done in f32 — mathematically identical to applying them in sequence.
    w23 = w2.astype(jnp.float32) @ w3.astype(jnp.float32)            # (mid, mid)
    b23 = b2.astype(jnp.float32) @ w3.astype(jnp.float32) + b3.astype(jnp.float32)  # (1, mid)

    # Pad the batch to a multiple of 8 (Mosaic sublane constraint) so we never
    # fall back to a single full-batch block.
    B_pad = _round_up(B, 8)
    s_in = jnp.pad(s, ((0, B_pad - B), (0, 0))) if B_pad != B else s

    # Batch-tile heuristic:
    #  * cap tiles at 2048 rows (tiny VMEM footprint at these feature widths,
    #    but big enough that the ~0.35 us per-grid-step overhead amortizes),
    #  * when the batch is large enough, make at least 2 tiles so v7x's two
    #    TensorCores can both stream the "parallel" batch axis.
    CAP = 2048
    if block_b is None:
        if B_pad <= 1024:
            block_b = B_pad                       # single tile; nothing to split
        elif B_pad <= 2 * CAP:
            block_b = _round_up(pl.cdiv(B_pad, 2), 8)   # exactly 2 tiles for megacore
        else:
            block_b = CAP
    else:
        block_b = _round_up(max(8, min(block_b, B_pad)), 8)
    block_b = min(block_b, B_pad)

    grid = (pl.cdiv(B_pad, block_b),)

    in_specs = [
        pl.BlockSpec((block_b, state_dim), lambda i: (i, 0)),   # s (batch-tiled)
        pl.BlockSpec((state_dim, mid),     lambda i: (0, 0)),   # w1 (VMEM-resident)
        pl.BlockSpec((1, mid),             lambda i: (0, 0)),   # b1
        pl.BlockSpec((mid, mid),           lambda i: (0, 0)),   # w23 (fused w2@w3)
        pl.BlockSpec((1, mid),             lambda i: (0, 0)),   # b23
        pl.BlockSpec((mid, action_dim),    lambda i: (0, 0)),   # w4
        pl.BlockSpec((1, action_dim),      lambda i: (0, 0)),   # b4
    ]
    out_specs = pl.BlockSpec((block_b, action_dim), lambda i: (i, 0))

    out_padded = pl.pallas_call(
        _share_ppo_fwd_kernel,
        out_shape=jax.ShapeDtypeStruct((B_pad, action_dim), s.dtype),
        grid_spec=pltpu.PrefetchScalarGridSpec(
            num_scalar_prefetch=0,
            grid=grid,
            in_specs=in_specs,
            out_specs=out_specs,
        ),
        compiler_params=pltpu.CompilerParams(
            # lets v7x shard batch tiles over its 2 TensorCores
            dimension_semantics=("parallel",)),
    )(s_in, w1, b1, w23, b23, w4, b4)

    return out_padded[:B] if B_pad != B else out_padded


def _ref_forward(s, p):
    """Pure-JAX reference matching torch: tanh(dec_a(enc_s(s))) — 4 matmuls."""
    h = jnp.maximum(s @ p["w1"] + p["b1"], 0.0)
    s_enc = h @ p["w2"] + p["b2"]
    g = jnp.maximum(s_enc @ p["w3"] + p["b3"], 0.0)
    return jnp.tanh(g @ p["w4"] + p["b4"])


if __name__ == "__main__":
    # Small shapes consistent with the module: state_dim=32, mid_dim=32,
    # action_dim=4.
    state_dim, mid_dim, action_dim = 32, 32, 4

    key = jax.random.PRNGKey(0)
    ks = jax.random.split(key, 10)

    # TODO(synk): torch orthogonal / constant-bias init is host-side setup,
    # not kernel work; deterministic random weights are used for the check.
    params = {
        "w1": jax.random.normal(ks[0], (state_dim, mid_dim), jnp.float32) * (1.0 / state_dim ** 0.5),
        "b1": jax.random.normal(ks[1], (1, mid_dim), jnp.float32) * 0.1,
        "w2": jax.random.normal(ks[2], (mid_dim, mid_dim), jnp.float32) * (1.0 / mid_dim ** 0.5),
        "b2": jax.random.normal(ks[3], (1, mid_dim), jnp.float32) * 0.1,
        "w3": jax.random.normal(ks[4], (mid_dim, mid_dim), jnp.float32) * (1.0 / mid_dim ** 0.5),
        "b3": jax.random.normal(ks[5], (1, mid_dim), jnp.float32) * 0.1,
        "w4": jax.random.normal(ks[6], (mid_dim, action_dim), jnp.float32) * 0.01,
        "b4": jnp.full((1, action_dim), 1e-6, jnp.float32),
    }

    # Case 1: tiny batch (pads 2 -> 8, single tile).
    B1 = 2
    s1 = jax.random.normal(ks[7], (B1, state_dim), jnp.float32)
    out1 = jax.block_until_ready(share_ppo_forward(s1, params))
    ref1 = _ref_forward(s1, params)
    assert out1.shape == (B1, action_dim), out1.shape
    assert out1.dtype == s1.dtype
    assert jnp.allclose(out1, ref1, atol=1e-5, rtol=1e-5), (
        f"mismatch: max abs err {jnp.max(jnp.abs(out1 - ref1))}")

    # Case 2: non-multiple-of-8 batch with multiple grid steps (exercises
    # host padding + the 2-tile megacore path + tail masking).
    B2 = 1300
    s2 = jax.random.normal(ks[8], (B2, state_dim), jnp.float32)
    out2 = jax.block_until_ready(share_ppo_forward(s2, params))
    ref2 = _ref_forward(s2, params)
    assert out2.shape == (B2, action_dim), out2.shape
    assert jnp.allclose(out2, ref2, atol=1e-5, rtol=1e-5), (
        f"mismatch: max abs err {jnp.max(jnp.abs(out2 - ref2))}")

    print("KERNEL_OK")
</pallas_src>

<mosaic_0001>
module attributes {stable_mosaic.version = 11 : i64} {
  func.func @_share_ppo_fwd_kernel(%arg0: i32, %arg1: memref<8x32xf32, #tpu.memory_space<vmem>>, %arg2: memref<32x32xf32, #tpu.memory_space<vmem>>, %arg3: memref<1x32xf32, #tpu.memory_space<vmem>>, %arg4: memref<32x32xf32, #tpu.memory_space<vmem>>, %arg5: memref<1x32xf32, #tpu.memory_space<vmem>>, %arg6: memref<32x4xf32, #tpu.memory_space<vmem>>, %arg7: memref<1x4xf32, #tpu.memory_space<vmem>>, %arg8: memref<8x4xf32, #tpu.memory_space<vmem>>) attributes {dimension_semantics = [#tpu.dimension_semantics<parallel>], iteration_bounds = array<i64: 1>, scalar_prefetch = 0 : i64, scratch_operands = 0 : i64, tpu.core_type = #tpu.core_type<tc>, window_params = [{transform_indices = @transform_0, window_bounds = array<i64: 8, 32>}, {pipeline_mode = #tpu.pipeline_mode<synchronous>, transform_indices = @transform_1, window_bounds = array<i64: 32, 32>}, {pipeline_mode = #tpu.pipeline_mode<synchronous>, transform_indices = @transform_2, window_bounds = array<i64: 1, 32>}, {pipeline_mode = #tpu.pipeline_mode<synchronous>, transform_indices = @transform_3, window_bounds = array<i64: 32, 32>}, {pipeline_mode = #tpu.pipeline_mode<synchronous>, transform_indices = @transform_4, window_bounds = array<i64: 1, 32>}, {pipeline_mode = #tpu.pipeline_mode<synchronous>, transform_indices = @transform_5, window_bounds = array<i64: 32, 4>}, {pipeline_mode = #tpu.pipeline_mode<synchronous>, transform_indices = @transform_6, window_bounds = array<i64: 1, 4>}, {transform_indices = @transform_7, window_bounds = array<i64: 8, 4>}]} {
    %c0 = arith.constant 0 : index
    %c0_0 = arith.constant 0 : index
    %0 = vector.load %arg1[%c0, %c0_0] : memref<8x32xf32, #tpu.memory_space<vmem>>, vector<8x32xf32>
    %c0_1 = arith.constant 0 : index
    %c0_2 = arith.constant 0 : index
    %1 = vector.load %arg2[%c0_1, %c0_2] : memref<32x32xf32, #tpu.memory_space<vmem>>, vector<32x32xf32>
    %cst = arith.constant dense<0.000000e+00> : vector<8x32xf32>
    %2 = tpu.matmul %0, %1, %cst {dimension_numbers = #tpu.dot_dimension_numbers<[1], [0], [0], [1], [0, 0, 1, 1], [], []>} : vector<8x32xf32>, vector<32x32xf32>, vector<8x32xf32> -> vector<8x32xf32>
    %c0_3 = arith.constant 0 : index
    %c0_4 = arith.constant 0 : index
    %3 = vector.load %arg3[%c0_3, %c0_4] : memref<1x32xf32, #tpu.memory_space<vmem>>, vector<1x32xf32>
    %4 = vector.broadcast %3 : vector<1x32xf32> to vector<8x32xf32>
    %5 = arith.addf %2, %4 : vector<8x32xf32>
    %cst_5 = arith.constant 0.000000e+00 : f32
    %6 = vector.broadcast %cst_5 : f32 to vector<8x32xf32>
    %7 = arith.maximumf %5, %6 : vector<8x32xf32>
    %c0_6 = arith.constant 0 : index
    %c0_7 = arith.constant 0 : index
    %8 = vector.load %arg4[%c0_6, %c0_7] : memref<32x32xf32, #tpu.memory_space<vmem>>, vector<32x32xf32>
    %cst_8 = arith.constant dense<0.000000e+00> : vector<8x32xf32>
    %9 = tpu.matmul %7, %8, %cst_8 {dimension_numbers = #tpu.dot_dimension_numbers<[1], [0], [0], [1], [0, 0, 1, 1], [], []>} : vector<8x32xf32>, vector<32x32xf32>, vector<8x32xf32> -> vector<8x32xf32>
    %c0_9 = arith.constant 0 : index
    %c0_10 = arith.constant 0 : index
    %10 = vector.load %arg5[%c0_9, %c0_10] : memref<1x32xf32, #tpu.memory_space<vmem>>, vector<1x32xf32>
    %11 = vector.broadcast %10 : vector<1x32xf32> to vector<8x32xf32>
    %12 = arith.addf %9, %11 : vector<8x32xf32>
    %cst_11 = arith.constant 0.000000e+00 : f32
    %13 = vector.broadcast %cst_11 : f32 to vector<8x32xf32>
    %14 = arith.maximumf %12, %13 : vector<8x32xf32>
    %c0_12 = arith.constant 0 : index
    %c0_13 = arith.constant 0 : index
    %15 = vector.load %arg6[%c0_12, %c0_13] : memref<32x4xf32, #tpu.memory_space<vmem>>, vector<32x4xf32>
    %cst_14 = arith.constant dense<0.000000e+00> : vector<8x4xf32>
    %16 = tpu.matmul %14, %15, %cst_14 {dimension_numbers = #tpu.dot_dimension_numbers<[1], [0], [0], [1], [0, 0, 1, 1], [], []>} : vector<8x32xf32>, vector<32x4xf32>, vector<8x4xf32> -> vector<8x4xf32>
    %c0_15 = arith.constant 0 : index
    %c0_16 = arith.constant 0 : index
    %17 = vector.load %arg7[%c0_15, %c0_16] : memref<1x4xf32, #tpu.memory_space<vmem>>, vector<1x4xf32>
    %18 = vector.broadcast %17 : vector<1x4xf32> to vector<8x4xf32>
    %19 = arith.addf %16, %18 : vector<8x4xf32>
    %20 = math.tanh %19 : vector<8x4xf32>
    %c0_17 = arith.constant 0 : index
    %c0_18 = arith.constant 0 : index
    %21 = vector.load %arg8[%c0_17, %c0_18] : memref<8x4xf32, #tpu.memory_space<vmem>>, vector<8x4xf32>
    tpu.vector_store %arg8[%c0_17, %c0_18], %20 {strides = array<i32>} : memref<8x4xf32, #tpu.memory_space<vmem>>, vector<8x4xf32>,
    return
  }
  func.func @transform_0(%arg0: i32) -> (i32, i32) {
    %c0_i32 = arith.constant 0 : i32
    %c0_i32_0 = arith.constant 0 : i32
    return %arg0, %c0_i32 : i32, i32
  }
  func.func @transform_1(%arg0: i32) -> (i32, i32) {
    %c0_i32 = arith.constant 0 : i32
    %c0_i32_0 = arith.constant 0 : i32
    %c0_i32_1 = arith.constant 0 : i32
    return %c0_i32, %c0_i32_0 : i32, i32
  }
  func.func @transform_2(%arg0: i32) -> (i32, i32) {
    %c0_i32 = arith.constant 0 : i32
    %c0_i32_0 = arith.constant 0 : i32
    %c0_i32_1 = arith.constant 0 : i32
    return %c0_i32, %c0_i32_0 : i32, i32
  }
  func.func @transform_3(%arg0: i32) -> (i32, i32) {
    %c0_i32 = arith.constant 0 : i32
    %c0_i32_0 = arith.constant 0 : i32
    %c0_i32_1 = arith.constant 0 : i32
    return %c0_i32, %c0_i32_0 : i32, i32
  }
  func.func @transform_4(%arg0: i32) -> (i32, i32) {
    %c0_i32 = arith.constant 0 : i32
    %c0_i32_0 = arith.constant 0 : i32
    %c0_i32_1 = arith.constant 0 : i32
    return %c0_i32, %c0_i32_0 : i32, i32
  }
  func.func @transform_5(%arg0: i32) -> (i32, i32) {
    %c0_i32 = arith.constant 0 : i32
    %c0_i32_0 = arith.constant 0 : i32
    %c0_i32_1 = arith.constant 0 : i32
    return %c0_i32, %c0_i32_0 : i32, i32
  }
  func.func @transform_6(%arg0: i32) -> (i32, i32) {
    %c0_i32 = arith.constant 0 : i32
    %c0_i32_0 = arith.constant 0 : i32
    %c0_i32_1 = arith.constant 0 : i32
    return %c0_i32, %c0_i32_0 : i32, i32
  }
  func.func @transform_7(%arg0: i32) -> (i32, i32) {
    %c0_i32 = arith.constant 0 : i32
    %c0_i32_0 = arith.constant 0 : i32
    return %arg0, %c0_i32 : i32, i32
  }
}

</mosaic_0001>

<bundles_post_ra>
// kernel: tpu_custom_call.1
= control target key start
LH: loop header
LB: loop body
LE: loop exit
PB: predicated region body
PF: predicated region fallthrough
CT: control target
= control target key end

     0   :  { %12 = vsyncpa [#allocation3], 0  ;;  %s566_s0 = inlined_call_operand.hbm [shape: f32[8,32], index: 0, kind: input, shape index: {}]   ;;  %s567_s1 = inlined_call_operand.vmem [shape: f32[32,32], index: 1, kind: input, shape index: {}]   ;;  %s568_s2 = inlined_call_operand.vmem [shape: f32[1,32], index: 2, kind: input, shape index: {}]   ;;  %s569_s3 = inlined_call_operand.hbm [shape: f32[32,32], index: 3, kind: input, shape index: {}]   ;;  %s570_s4 = inlined_call_operand.vmem [shape: f32[1,32], index: 4, kind: input, shape index: {}]   ;;  %s571_s5 = inlined_call_operand.vmem [shape: f32[32,4], index: 5, kind: input, shape index: {}]   ;;  %s572_s6 = inlined_call_operand.vmem [shape: f32[1,4], index: 6, kind: input, shape index: {}]   ;;  %s573_s7 = inlined_call_operand.vmem [shape: f32[8,4], index: 7, kind: output, shape index: {}]  }
   0x1   :  { %13 = vsyncpa [#allocation5], 0  ;;  %s446_s24 = smov [#allocation2]   ;;  %s447_s26 = smov [#allocation4]  }
   0x2   :  { %s20_s25 = sshll.u32 %s446_s24, 4  ;;  %s33_s27 = sshll.u32 %s447_s26, 4  ;;  %s21_s25 = int_to_ptr.vmem [resolvable:$true] %s20_s25  ;;  %s493_s27 = int_to_ptr.vmem [resolvable:$true] %s33_s27 }
   0x3   :  { %s398_s30 = scalar_lea.hbm %s566_s0, 128 }
   0x4   :  { %p399_p0 = scmp.ne.s32.totalorder %s566_s0, %s398_s30  ;;  %p402_p1 = scmp.lt.u32.totalorder %s398_s30, %s566_s0 }
   0x6   :  { %p404_p2 = pnand %p402_p1, %p399_p0 }
   0x8   :  { %407 = shalt.err (!%p404_p2)
}
   0x9   :  { %s408_s12 = scalar_lea.vmem %s21_s25, 128  ;;  %p413_p4 = scmp.lt.s32.totalorder %s21_s25, %s21_s25 }
   0xa   :  { %p409_p3 = scmp.ne.s32.totalorder %s21_s25, %s408_s12  ;;  %p414_p5 = scmp.lt.s32.totalorder %s408_s12, %s408_s12 }
   0xc   :  { %p415_p6 = por %p414_p5, %p413_p4 }
   0xe   :  { %p416_p7 = pnand %p415_p6, %p409_p3 }
  0x10   :  { %419 = shalt.err (!%p416_p7)
}
  0x11   :  { %23 = dma.hbm_to_vmem [thread:$0]  %s566_s0, 128, %s21_s25, [#allocation3]  }
  0x12   :  { %s420_s17 = scalar_lea.hbm %s569_s3, 512 }
  0x13   :  { %p421_p8 = scmp.ne.s32.totalorder %s569_s3, %s420_s17  ;;  %p424_p9 = scmp.lt.u32.totalorder %s420_s17, %s569_s3 }
  0x15   :  { %p426_p10 = pnand %p424_p9, %p421_p8 }
  0x17   :  { %429 = shalt.err (!%p426_p10)
}
  0x18   :  { %s430_s22 = scalar_lea.vmem %s493_s27, 512  ;;  %p435_p12 = scmp.lt.s32.totalorder %s493_s27, %s493_s27 }
  0x19   :  { %p431_p11 = scmp.ne.s32.totalorder %s493_s27, %s430_s22  ;;  %p436_p13 = scmp.lt.s32.totalorder %s430_s22, %s430_s22 }
  0x1b   :  { %p437_p0 = por %p436_p13, %p435_p12 }
  0x1d   :  { %p438_p1 = pnand %p437_p0, %p431_p11 }
  0x1f   :  { %441 = shalt.err (!%p438_p1)
}
  0x20   :  { %s448_s0 = smov 128   ;;  %s449_s23 = smov 8  }
  0x21   :  { %39 = dma.hbm_to_vmem [thread:$0]  %s569_s3, 512, %s493_s27, [#allocation5], %s448_s0, %s448_s0, %s449_s23  }
  0x22   :  { %442 = dma.done.wait [#allocation3], 128  }
  0x23   :  { %443 = vsyncadd [#allocation3], 4294967168 }
  0x24   :  { %444 = dma.done.wait [#allocation5], 512  }
  0x25   :  { %445 = vsyncadd [#allocation5], 4294966784  ;;  %v450_v0 = vmov 0.0|0.0   ;;  %vm451_vm0 = vmmov 0   ;;  %v452_v1 = vmov 0.0   ;;  %v53_v2 = vld [vmem:[%s567_s1] sm:$0xff] }
  0x26   :  { %371 = vmatprep.subr.bf16.mxu0 %v450_v0  ;;  %346 = vmatprep.mubr.msk.f32.mxu0 %vm451_vm0, %v452_v1  ;;  %v54_v3 = vld [vmem:[%s567_s1 + $0x8] sm:$0xff]  ;;  %v55_v4 = vld [vmem:[%s567_s1 + $0x10] sm:$0xff]  ;;  %v56_v6 = vld [vmem:[%s567_s1 + $0x18] sm:$0xff]  ;;  %vm64_vm1 = vcmask 261120   ;;  %vm309_vm2 = vcmask 31744  }
  0x27   :  { %377 = vmatprep.subr.bf16.mxu1 %v450_v0  ;;  %357 = vmatprep.mubr.msk.f32.mxu1 %vm451_vm0, %v452_v1  ;;  %v372_v5 = vpack.c.bf16 %v54_v3, %v53_v2  ;;  %v139_v7 = vld [vmem:[#allocation4] sm:$0xff]  ;;  %v140_v8 = vld [vmem:[#allocation4 + $0x8] sm:$0xff]  ;;  %v375_v9 = vpack.c.bf16 %v56_v6, %v55_v4  ;;  %v52_v11 = vld [vmem:[#allocation2] sm:$0xff] }
  0x28   :  { %v378_v10 = vpack.c.bf16 %v140_v8, %v139_v7  ;;  %v141_v12 = vld [vmem:[#allocation4 + $0x10] sm:$0xff]  ;;  %v142_v13 = vld [vmem:[#allocation4 + $0x18] sm:$0xff]  ;;  %v225_v16 = vld [vmem:[%s571_s5 + $0x8] sm:$0xff] }
  0x29   :  { %373 = vmatpush3.bf16.msra.mxu0 %v372_v5  ;;  %v381_v14 = vpack.c.bf16 %v142_v13, %v141_v12  ;;  %v224_v15 = vld [vmem:[%s571_s5] sm:$0xff]  ;;  %v226_v23 = vld [vmem:[%s571_s5 + $0x10] sm:$0xff]  ;;  %v227_v24 = vld [vmem:[%s571_s5 + $0x18] sm:$0xff] }
  0x2a   :  { %374 = vmatprep.subr.bf16.mxu0 %v450_v0  ;;  %379 = vmatpush3.bf16.msra.mxu1 %v378_v10  ;;  %v384_v17 = vpack.c.bf16 %v225_v16, %v224_v15  ;;  %v317_v18 = vld [vmem:[%s568_s2] ss:$0 sm:$0xff]  ;;  %v387_v25 = vpack.c.bf16 %v227_v24, %v226_v23 }
  0x2b   :  { %380 = vmatprep.subr.bf16.mxu1 %v450_v0  ;;  %v319_v26 = vld [vmem:[%s570_s4] ss:$0 sm:$0xff] }
  0x2c   :  { %v321_v31 = vld [vmem:[%s572_s6] ss:$0 sm:$0xff] }
  0x2d   :  { %376 = vmatpush3.bf16.msra.mxu0 %v375_v9 }
  0x2e   :  { %383 = vmatprep.subr.bf16.mxu0 %v450_v0  ;;  %382 = vmatpush3.bf16.msra.mxu1 %v381_v14 }
  0x30   :  { %347 = vmatmul.mubr.msk.f32.vlgmr.msra.gmra.mrb[0].mxu0 %vm64_vm1, %v52_v11 }
  0x31   :  { %368 = vmatprep.mubr.msk.f32.mxu0 %vm451_vm0, %v452_v1  ;;  %385 = vmatpush3.bf16.msra.mxu0 %v384_v17 }
  0x32   :  { %386 = vmatprep.subr.bf16.mxu0 %v450_v0 }
  0x35   :  { %388 = vmatpush3.bf16.msra.mxu0 %v387_v25 }
 0x103   :  { %v134_v19 = vpop.f32.mrb[0].mxu0 }
 0x104   :  { %v135_v20 = vadd.f32 %v317_v18, %v134_v19  ;;  %v348_v21 = vpop.f32.mrb[1].mxu0 }
 0x106   :  { %v138_v22 = vmax.f32 %v135_v20, 0.0 }
 0x108   :  { %358 = vmatmul.mubr.msk.f32.vlgmr.msra.gmra.mrb[0].mxu1 %vm64_vm1, %v138_v22 }
 0x1db   :  { %v219_v27 = vpop.f32.mrb[0].mxu1 }
 0x1dc   :  { %v220_v28 = vadd.f32 %v319_v26, %v219_v27  ;;  %v359_v29 = vpop.f32.mrb[1].mxu1 }
 0x1de   :  { %v223_v30 = vmax.f32 %v220_v28, 0.0 }
 0x1e0   :  { %369 = vmatmul.mubr.msk.f32.vlgmr.msra.gmra.mrb[2].mxu0 %vm64_vm1, %v223_v30 }
 0x2b3   :  { %v304_v32 = vpop.f32.mrb[2].mxu0 }
 0x2b4   :  { %v305_v33 = vadd.f32 %v321_v31, %v304_v32  ;;  %v370_v34 = vpop.f32.mrb[3].mxu0 }
 0x2b6   :  { %396 = vtanh.f32 %v305_v33 }
 0x2c0   :  { %v397_v35 = vpop.eup %396 }
 0x2c1   :  { %310 = vst.msk [vmem:[%s573_s7] sm:$0xff] %vm309_vm2, %v397_v35 }
 0x2c2   :  { %315 = vsyncpa [#allocation3], 1 }
 0x2c3   :  { %316 = vsyncpa [#allocation5], 1 }

</bundles_post_ra>
